<compile_context>
chip_gen: v7x
topology: tpu7x:2x2x1
jax: 0.10.0
libtpu: 0.0.40
codegen_flags: <defaults>
</compile_context>

<pallas_src>
import jax
import jax.numpy as jnp
from jax.experimental import pallas as pl
from jax.experimental.pallas import tpu as pltpu


def _fused_kernel(x_ref, w1_ref, b1_ref, w2_ref, b2_ref, wc_ref, bc_ref,
                  ftr_ref, prd_ref):
    """Single invocation: all 14 heads fused into three lane-dense matmuls."""
    x = x_ref[...]                                                  # (B, I)

    # layer 1 (all heads): Linear (BN scale pre-folded) -> +shift -> ReLU
    h1 = jnp.dot(x, w1_ref[...], preferred_element_type=jnp.float32)   # (B, C*F)
    h1 = jnp.maximum(h1 + b1_ref[...], 0.0)

    # layer 2 (all heads, block-diagonal): Linear -> +shift -> ReLU
    h2 = jnp.dot(h1, w2_ref[...], preferred_element_type=jnp.float32)  # (B, C*F)
    h2 = jnp.maximum(h2 + b2_ref[...], 0.0)

    ftr_ref[...] = h2.astype(ftr_ref.dtype)                            # (B, C*F)

    # classifiers (all heads, block-diagonal columns): Linear -> +shift
    z = jnp.dot(h2, wc_ref[...], preferred_element_type=jnp.float32)   # (B, C)
    prd_ref[...] = (z + bc_ref[...]).astype(prd_ref.dtype)


def fully_connected_layer(x, params):
    """x: (B, inp_dim) f32. params: dict of stacked per-head tensors."""
    B, inp_dim = x.shape
    n_cls, _, ftr_dim = params["w1"].shape
    nf = n_cls * ftr_dim

    # ---- fold BN scales into weights, fuse heads into lane-dense slabs ----
    eye = jnp.eye(n_cls, dtype=jnp.float32)

    w1s = params["w1"] * params["s1"][:, None, :]                # (C, I, F)
    w1f = jnp.transpose(w1s, (1, 0, 2)).reshape(inp_dim, nf)     # (I, C*F)
    b1f = params["b1"].reshape(1, nf)

    w2s = params["w2"] * params["s2"][:, None, :]                # (C, F, F)
    w2bd = jnp.einsum("cjk,cd->cjdk", w2s, eye).reshape(nf, nf)  # block-diag
    b2f = params["b2"].reshape(1, nf)

    wcs = params["wc"][:, :, 0] * params["sc"]                   # (C, F)
    wcbd = jnp.einsum("cj,cd->cjd", wcs, eye).reshape(nf, n_cls)  # (C*F, C)
    bcf = params["bc"].reshape(1, n_cls)

    ftr_slab, prd = pl.pallas_call(
        _fused_kernel,
        grid_spec=pltpu.PrefetchScalarGridSpec(
            num_scalar_prefetch=0,
            grid=(1,),
            in_specs=[
                pl.BlockSpec((B, inp_dim), lambda i: (0, 0)),    # x
                pl.BlockSpec((inp_dim, nf), lambda i: (0, 0)),   # W1 fused
                pl.BlockSpec((1, nf), lambda i: (0, 0)),         # bn1 shift
                pl.BlockSpec((nf, nf), lambda i: (0, 0)),        # W2 block-diag
                pl.BlockSpec((1, nf), lambda i: (0, 0)),         # bn2 shift
                pl.BlockSpec((nf, n_cls), lambda i: (0, 0)),     # Wc block-diag
                pl.BlockSpec((1, n_cls), lambda i: (0, 0)),      # bnc shift
            ],
            out_specs=[
                pl.BlockSpec((B, nf), lambda i: (0, 0)),         # ftr slab
                pl.BlockSpec((B, n_cls), lambda i: (0, 0)),      # prd (final layout)
            ],
        ),
        out_shape=[
            jax.ShapeDtypeStruct((B, nf), jnp.float32),
            jax.ShapeDtypeStruct((B, n_cls), jnp.float32),
        ],
        compiler_params=pltpu.CompilerParams(
            dimension_semantics=("arbitrary",)),
    )(x, w1f, b1f, w2bd, b2f, wcbd, bcf)

    # Match the PyTorch return structure:
    #   ftr_lst: list of 14 tensors of shape (B, 1, ftr_dim)
    #   prd:     (B, 14)
    ftr_3d = ftr_slab.reshape(B, n_cls, ftr_dim)
    ftr_lst = [ftr_3d[:, c:c + 1, :] for c in range(n_cls)]
    return ftr_lst, prd


def _fold_bn(gamma, beta, mean, var, eps=1e-5):
    scale = gamma / jnp.sqrt(var + eps)
    shift = beta - mean * scale
    return scale, shift


def make_params(key, inp_dim, ftr_dim, n_cls=14):
    ks = jax.random.split(key, 16)
    w1 = jax.random.normal(ks[0], (n_cls, inp_dim, ftr_dim), jnp.float32) * 0.05
    w2 = jax.random.normal(ks[1], (n_cls, ftr_dim, ftr_dim), jnp.float32) * 0.05
    wc = jax.random.normal(ks[2], (n_cls, ftr_dim, 1), jnp.float32) * 0.05

    def bn(kg, kb, km, kv, shape):
        gamma = jax.random.uniform(kg, shape, jnp.float32, 0.5, 1.5)
        beta = jax.random.normal(kb, shape, jnp.float32) * 0.1
        mean = jax.random.normal(km, shape, jnp.float32) * 0.1
        var = jax.random.uniform(kv, shape, jnp.float32, 0.5, 1.5)
        return _fold_bn(gamma, beta, mean, var)

    s1, b1 = bn(ks[3], ks[4], ks[5], ks[6], (n_cls, ftr_dim))
    s2, b2 = bn(ks[7], ks[8], ks[9], ks[10], (n_cls, ftr_dim))
    sc, bc = bn(ks[11], ks[12], ks[13], ks[14], (n_cls, 1))

    return dict(w1=w1, s1=s1, b1=b1, w2=w2, s2=s2, b2=b2, wc=wc, sc=sc, bc=bc)


def reference(x, p):
    """Pure-JAX per-head reference for validation."""
    ftr_lst, prd_cols = [], []
    for c in range(p["w1"].shape[0]):
        h1 = jnp.maximum(x @ p["w1"][c] * p["s1"][c] + p["b1"][c], 0.0)
        h2 = jnp.maximum(h1 @ p["w2"][c] * p["s2"][c] + p["b2"][c], 0.0)
        ftr_lst.append(h2[:, None, :])
        z = h2 @ p["wc"][c] * p["sc"][c] + p["bc"][c]
        prd_cols.append(z)
    return ftr_lst, jnp.concatenate(prd_cols, axis=1)


if __name__ == "__main__":
    B, INP_DIM, FTR_DIM = 8, 64, 32
    key = jax.random.PRNGKey(0)
    kx, kp = jax.random.split(key)
    x = jax.random.normal(kx, (B, INP_DIM), jnp.float32)
    params = make_params(kp, INP_DIM, FTR_DIM)

    ftr_lst, prd = jax.jit(fully_connected_layer)(x, params)
    jax.block_until_ready(prd)
    jax.block_until_ready(ftr_lst)

    ftr_ref, prd_ref = reference(x, params)
    assert prd.shape == (B, 14)
    assert len(ftr_lst) == 14 and ftr_lst[0].shape == (B, 1, FTR_DIM)
    assert jnp.allclose(prd, prd_ref, atol=1e-4, rtol=1e-4)
    for a, b in zip(ftr_lst, ftr_ref):
        assert jnp.allclose(a, b, atol=1e-4, rtol=1e-4)

    print("KERNEL_OK")
</pallas_src>

<mosaic_0001>
module attributes {stable_mosaic.version = 11 : i64} {
  func.func @_fused_kernel(%arg0: i32, %arg1: memref<8x64xf32, #tpu.memory_space<vmem>>, %arg2: memref<64x448xf32, #tpu.memory_space<vmem>>, %arg3: memref<1x448xf32, #tpu.memory_space<vmem>>, %arg4: memref<448x448xf32, #tpu.memory_space<vmem>>, %arg5: memref<1x448xf32, #tpu.memory_space<vmem>>, %arg6: memref<448x14xf32, #tpu.memory_space<vmem>>, %arg7: memref<1x14xf32, #tpu.memory_space<vmem>>, %arg8: memref<8x448xf32, #tpu.memory_space<vmem>>, %arg9: memref<8x14xf32, #tpu.memory_space<vmem>>) attributes {dimension_semantics = [#tpu.dimension_semantics<arbitrary>], iteration_bounds = array<i64: 1>, scalar_prefetch = 0 : i64, scratch_operands = 0 : i64, tpu.core_type = #tpu.core_type<tc>, window_params = [{pipeline_mode = #tpu.pipeline_mode<synchronous>, transform_indices = @transform_0, window_bounds = array<i64: 8, 64>}, {pipeline_mode = #tpu.pipeline_mode<synchronous>, transform_indices = @transform_1, window_bounds = array<i64: 64, 448>}, {pipeline_mode = #tpu.pipeline_mode<synchronous>, transform_indices = @transform_2, window_bounds = array<i64: 1, 448>}, {pipeline_mode = #tpu.pipeline_mode<synchronous>, transform_indices = @transform_3, window_bounds = array<i64: 448, 448>}, {pipeline_mode = #tpu.pipeline_mode<synchronous>, transform_indices = @transform_4, window_bounds = array<i64: 1, 448>}, {pipeline_mode = #tpu.pipeline_mode<synchronous>, transform_indices = @transform_5, window_bounds = array<i64: 448, 14>}, {pipeline_mode = #tpu.pipeline_mode<synchronous>, transform_indices = @transform_6, window_bounds = array<i64: 1, 14>}, {pipeline_mode = #tpu.pipeline_mode<synchronous>, transform_indices = @transform_7, window_bounds = array<i64: 8, 448>}, {pipeline_mode = #tpu.pipeline_mode<synchronous>, transform_indices = @transform_8, window_bounds = array<i64: 8, 14>}]} {
    %c0 = arith.constant 0 : index
    %c0_0 = arith.constant 0 : index
    %0 = vector.load %arg1[%c0, %c0_0] : memref<8x64xf32, #tpu.memory_space<vmem>>, vector<8x64xf32>
    %c0_1 = arith.constant 0 : index
    %c0_2 = arith.constant 0 : index
    %1 = vector.load %arg2[%c0_1, %c0_2] : memref<64x448xf32, #tpu.memory_space<vmem>>, vector<64x448xf32>
    %cst = arith.constant dense<0.000000e+00> : vector<8x448xf32>
    %2 = tpu.matmul %0, %1, %cst {dimension_numbers = #tpu.dot_dimension_numbers<[1], [0], [0], [1], [0, 0, 1, 1], [], []>} : vector<8x64xf32>, vector<64x448xf32>, vector<8x448xf32> -> vector<8x448xf32>
    %c0_3 = arith.constant 0 : index
    %c0_4 = arith.constant 0 : index
    %3 = vector.load %arg3[%c0_3, %c0_4] : memref<1x448xf32, #tpu.memory_space<vmem>>, vector<1x448xf32>
    %4 = vector.broadcast %3 : vector<1x448xf32> to vector<8x448xf32>
    %5 = arith.addf %2, %4 : vector<8x448xf32>
    %cst_5 = arith.constant 0.000000e+00 : f32
    %6 = vector.broadcast %cst_5 : f32 to vector<8x448xf32>
    %7 = arith.maximumf %5, %6 : vector<8x448xf32>
    %c0_6 = arith.constant 0 : index
    %c0_7 = arith.constant 0 : index
    %8 = vector.load %arg4[%c0_6, %c0_7] : memref<448x448xf32, #tpu.memory_space<vmem>>, vector<448x448xf32>
    %cst_8 = arith.constant dense<0.000000e+00> : vector<8x448xf32>
    %9 = tpu.matmul %7, %8, %cst_8 {dimension_numbers = #tpu.dot_dimension_numbers<[1], [0], [0], [1], [0, 0, 1, 1], [], []>} : vector<8x448xf32>, vector<448x448xf32>, vector<8x448xf32> -> vector<8x448xf32>
    %c0_9 = arith.constant 0 : index
    %c0_10 = arith.constant 0 : index
    %10 = vector.load %arg5[%c0_9, %c0_10] : memref<1x448xf32, #tpu.memory_space<vmem>>, vector<1x448xf32>
    %11 = vector.broadcast %10 : vector<1x448xf32> to vector<8x448xf32>
    %12 = arith.addf %9, %11 : vector<8x448xf32>
    %cst_11 = arith.constant 0.000000e+00 : f32
    %13 = vector.broadcast %cst_11 : f32 to vector<8x448xf32>
    %14 = arith.maximumf %12, %13 : vector<8x448xf32>
    %c0_12 = arith.constant 0 : index
    %c0_13 = arith.constant 0 : index
    %15 = vector.load %arg8[%c0_12, %c0_13] : memref<8x448xf32, #tpu.memory_space<vmem>>, vector<8x448xf32>
    tpu.vector_store %arg8[%c0_12, %c0_13], %14 {strides = array<i32>} : memref<8x448xf32, #tpu.memory_space<vmem>>, vector<8x448xf32>,
    %c0_14 = arith.constant 0 : index
    %c0_15 = arith.constant 0 : index
    %16 = vector.load %arg6[%c0_14, %c0_15] : memref<448x14xf32, #tpu.memory_space<vmem>>, vector<448x14xf32>
    %cst_16 = arith.constant dense<0.000000e+00> : vector<8x14xf32>
    %17 = tpu.matmul %14, %16, %cst_16 {dimension_numbers = #tpu.dot_dimension_numbers<[1], [0], [0], [1], [0, 0, 1, 1], [], []>} : vector<8x448xf32>, vector<448x14xf32>, vector<8x14xf32> -> vector<8x14xf32>
    %c0_17 = arith.constant 0 : index
    %c0_18 = arith.constant 0 : index
    %18 = vector.load %arg7[%c0_17, %c0_18] : memref<1x14xf32, #tpu.memory_space<vmem>>, vector<1x14xf32>
    %19 = vector.broadcast %18 : vector<1x14xf32> to vector<8x14xf32>
    %20 = arith.addf %17, %19 : vector<8x14xf32>
    %c0_19 = arith.constant 0 : index
    %c0_20 = arith.constant 0 : index
    %21 = vector.load %arg9[%c0_19, %c0_20] : memref<8x14xf32, #tpu.memory_space<vmem>>, vector<8x14xf32>
    tpu.vector_store %arg9[%c0_19, %c0_20], %20 {strides = array<i32>} : memref<8x14xf32, #tpu.memory_space<vmem>>, vector<8x14xf32>,
    return
  }
  func.func @transform_0(%arg0: i32) -> (i32, i32) {
    %c0_i32 = arith.constant 0 : i32
    %c0_i32_0 = arith.constant 0 : i32
    %c0_i32_1 = arith.constant 0 : i32
    return %c0_i32, %c0_i32_0 : i32, i32
  }
  func.func @transform_1(%arg0: i32) -> (i32, i32) {
    %c0_i32 = arith.constant 0 : i32
    %c0_i32_0 = arith.constant 0 : i32
    %c0_i32_1 = arith.constant 0 : i32
    return %c0_i32, %c0_i32_0 : i32, i32
  }
  func.func @transform_2(%arg0: i32) -> (i32, i32) {
    %c0_i32 = arith.constant 0 : i32
    %c0_i32_0 = arith.constant 0 : i32
    %c0_i32_1 = arith.constant 0 : i32
    return %c0_i32, %c0_i32_0 : i32, i32
  }
  func.func @transform_3(%arg0: i32) -> (i32, i32) {
    %c0_i32 = arith.constant 0 : i32
    %c0_i32_0 = arith.constant 0 : i32
    %c0_i32_1 = arith.constant 0 : i32
    return %c0_i32, %c0_i32_0 : i32, i32
  }
  func.func @transform_4(%arg0: i32) -> (i32, i32) {
    %c0_i32 = arith.constant 0 : i32
    %c0_i32_0 = arith.constant 0 : i32
    %c0_i32_1 = arith.constant 0 : i32
    return %c0_i32, %c0_i32_0 : i32, i32
  }
  func.func @transform_5(%arg0: i32) -> (i32, i32) {
    %c0_i32 = arith.constant 0 : i32
    %c0_i32_0 = arith.constant 0 : i32
    %c0_i32_1 = arith.constant 0 : i32
    return %c0_i32, %c0_i32_0 : i32, i32
  }
  func.func @transform_6(%arg0: i32) -> (i32, i32) {
    %c0_i32 = arith.constant 0 : i32
    %c0_i32_0 = arith.constant 0 : i32
    %c0_i32_1 = arith.constant 0 : i32
    return %c0_i32, %c0_i32_0 : i32, i32
  }
  func.func @transform_7(%arg0: i32) -> (i32, i32) {
    %c0_i32 = arith.constant 0 : i32
    %c0_i32_0 = arith.constant 0 : i32
    %c0_i32_1 = arith.constant 0 : i32
    return %c0_i32, %c0_i32_0 : i32, i32
  }
  func.func @transform_8(%arg0: i32) -> (i32, i32) {
    %c0_i32 = arith.constant 0 : i32
    %c0_i32_0 = arith.constant 0 : i32
    %c0_i32_1 = arith.constant 0 : i32
    return %c0_i32, %c0_i32_0 : i32, i32
  }
}

</mosaic_0001>

<bundles_post_ra>
// kernel: fully_connected_layer.1
= control target key start
LH: loop header
LB: loop body
LE: loop exit
PB: predicated region body
PF: predicated region fallthrough
CT: control target
= control target key end

     0   :  { %v1401_v7 = vmov 0.0   ;;  %vm84_vm0 = vcmask 523264   ;;  %s2470_s0 = inlined_call_operand.vmem [shape: f32[8,64], index: 0, kind: input, shape index: {}]   ;;  %s2471_s1 = inlined_call_operand.vmem [shape: f32[64,448], index: 1, kind: input, shape index: {}]   ;;  %s2472_s2 = inlined_call_operand.vmem [shape: f32[1,448], index: 2, kind: input, shape index: {}]   ;;  %s2473_s3 = inlined_call_operand.vmem [shape: f32[448,448], index: 3, kind: input, shape index: {}]   ;;  %s2474_s4 = inlined_call_operand.vmem [shape: f32[1,448], index: 4, kind: input, shape index: {}]   ;;  %s2475_s5 = inlined_call_operand.vmem [shape: f32[448,14], index: 5, kind: input, shape index: {}]   ;;  %s2476_s6 = inlined_call_operand.vmem [shape: f32[1,14], index: 6, kind: input, shape index: {}]   ;;  %s2477_s7 = inlined_call_operand.vmem [shape: f32[8,448], index: 7, kind: output, shape index: {0}]   ;;  %s2478_s8 = inlined_call_operand.hbm [shape: f32[8,14], index: 8, kind: output, shape index: {1}]  }
   0x1   :  { %v31_v0 = vld [vmem:[%s2471_s1 + $0x8] sm:$0xff]  ;;  %v30_v2 = vld [vmem:[%s2471_s1] sm:$0xff]  ;;  %152 = vmatprep.mubr.f32.mxu0 %v1401_v7  ;;  %223 = vmatprep.mubr.f32.mxu1 %v1401_v7  ;;  %v33_v20 = vld [vmem:[%s2471_s1 + $0x18] sm:$0xff] }
   0x2   :  { %v35_v1 = vld [vmem:[%s2471_s1 + $0x28] sm:$0xff]  ;;  %v34_v4 = vld [vmem:[%s2471_s1 + $0x20] sm:$0xff]  ;;  %v37_v21 = vld [vmem:[%s2471_s1 + $0x38] sm:$0xff] }
   0x3   :  { %v1042_v3 = vpack.c.bf16 %v35_v1, %v31_v0  ;;  %v39_v5 = vld [vmem:[%s2471_s1 + $0x48] sm:$0xff]  ;;  %v1044_v8 = vpack.c.bf16 %v34_v4, %v30_v2  ;;  %v38_v10 = vld [vmem:[%s2471_s1 + $0x40] sm:$0xff]  ;;  %v32_v22 = vld [vmem:[%s2471_s1 + $0x10] sm:$0xff]  ;;  %v1058_v24 = vpack.c.bf16 %v37_v21, %v33_v20 }
   0x4   :  { %v43_v6 = vld [vmem:[%s2471_s1 + $0x68] sm:$0xff]  ;;  %v42_v11 = vld [vmem:[%s2471_s1 + $0x60] sm:$0xff]  ;;  %v36_v23 = vld [vmem:[%s2471_s1 + $0x30] sm:$0xff] }
   0x5   :  { %v1046_v9 = vpack.c.bf16 %v43_v6, %v39_v5  ;;  %v47_v12 = vld [vmem:[%s2471_s1 + $0x88] sm:$0xff]  ;;  %1043 = vmatprep.subr.bf16.mxu0 %v1042_v3  ;;  %v1048_v14 = vpack.c.bf16 %v42_v11, %v38_v10  ;;  %v46_v15 = vld [vmem:[%s2471_s1 + $0x80] sm:$0xff]  ;;  %v1060_v25 = vpack.c.bf16 %v36_v23, %v32_v22  ;;  %v41_v26 = vld [vmem:[%s2471_s1 + $0x58] sm:$0xff]  ;;  %1059 = vmatprep.subr.bf16.mxu1 %v1058_v24 }
   0x6   :  { %v51_v13 = vld [vmem:[%s2471_s1 + $0xa8] sm:$0xff]  ;;  %1045 = vmatpush1.bf16.msra.mxu0 %v1044_v8  ;;  %v50_v16 = vld [vmem:[%s2471_s1 + $0xa0] sm:$0xff]  ;;  %v45_v27 = vld [vmem:[%s2471_s1 + $0x78] sm:$0xff] }
   0x7   :  { %1047 = vmatprep.subr.bf16.mxu0 %v1046_v9  ;;  %v1050_v17 = vpack.c.bf16 %v51_v13, %v47_v12  ;;  %v55_v18 = vld [vmem:[%s2471_s1 + $0xc8] sm:$0xff]  ;;  %v40_v28 = vld [vmem:[%s2471_s1 + $0x50] sm:$0xff]  ;;  %v1052_v29 = vpack.c.bf16 %v50_v16, %v46_v15  ;;  %v1062_v30 = vpack.c.bf16 %v45_v27, %v41_v26  ;;  %v49_v32 = vld [vmem:[%s2471_s1 + $0x98] sm:$0xff]  ;;  %1061 = vmatpush1.bf16.msra.mxu1 %v1060_v25 }
   0x8   :  { %v59_v19 = vld [vmem:[%s2471_s1 + $0xe8] sm:$0xff]  ;;  %v44_v31 = vld [vmem:[%s2471_s1 + $0x70] sm:$0xff]  ;;  %v53_v33 = vld [vmem:[%s2471_s1 + $0xb8] sm:$0xff] }
   0x9   :  { %v1054_v34 = vpack.c.bf16 %v59_v19, %v55_v18  ;;  %v54_v35 = vld [vmem:[%s2471_s1 + $0xc0] sm:$0xff]  ;;  %v1064_v37 = vpack.c.bf16 %v44_v31, %v40_v28  ;;  %v48_v38 = vld [vmem:[%s2471_s1 + $0x90] sm:$0xff]  ;;  %1063 = vmatprep.subr.bf16.mxu1 %v1062_v30  ;;  %v1066_v39 = vpack.c.bf16 %v53_v33, %v49_v32  ;;  %v235_v41 = vld [vmem:[%s2473_s3 + $0x8] sm:$0xff] }
   0xa   :  { %1049 = vmatpush1.bf16.msra.mxu0 %v1048_v14  ;;  %v58_v36 = vld [vmem:[%s2471_s1 + $0xe0] sm:$0xff]  ;;  %v52_v40 = vld [vmem:[%s2471_s1 + $0xb0] sm:$0xff]  ;;  %v239_v42 = vld [vmem:[%s2473_s3 + $0x28] sm:$0xff] }
   0xb   :  { %1051 = vmatprep.subr.bf16.mxu0 %v1050_v17  ;;  %v1056_v43 = vpack.c.bf16 %v58_v36, %v54_v35  ;;  %v57_v44 = vld [vmem:[%s2471_s1 + $0xd8] sm:$0xff]  ;;  %v1074_v46 = vpack.c.bf16 %v239_v42, %v235_v41  ;;  %v234_v47 = vld [vmem:[%s2473_s3] sm:$0xff]  ;;  %1065 = vmatpush1.bf16.msra.mxu1 %v1064_v37  ;;  %v1068_v49 = vpack.c.bf16 %v52_v40, %v48_v38  ;;  %v243_v50 = vld [vmem:[%s2473_s3 + $0x48] sm:$0xff] }
   0xc   :  { %v61_v45 = vld [vmem:[%s2471_s1 + $0xf8] sm:$0xff]  ;;  %v238_v48 = vld [vmem:[%s2473_s3 + $0x20] sm:$0xff]  ;;  %v247_v51 = vld [vmem:[%s2473_s3 + $0x68] sm:$0xff]  ;;  %1067 = vmatprep.subr.bf16.mxu1 %v1066_v39 }
   0xd   :  { %v1070_v52 = vpack.c.bf16 %v61_v45, %v57_v44  ;;  %v56_v53 = vld [vmem:[%s2471_s1 + $0xd0] sm:$0xff]  ;;  %v29_v55 = vld [vmem:[%s2470_s0] sm:$0xff]  ;;  %v237_v56 = vld [vmem:[%s2473_s3 + $0x18] sm:$0xff]  ;;  %v1076_v58 = vpack.c.bf16 %v238_v48, %v234_v47  ;;  %v1078_v59 = vpack.c.bf16 %v247_v51, %v243_v50 }
   0xe   :  { %1053 = vmatpush1.bf16.msra.mxu0 %v1052_v29  ;;  %v60_v54 = vld [vmem:[%s2471_s1 + $0xf0] sm:$0xff]  ;;  %v241_v57 = vld [vmem:[%s2473_s3 + $0x38] sm:$0xff]  ;;  %v242_v60 = vld [vmem:[%s2473_s3 + $0x40] sm:$0xff] }
   0xf   :  { %1055 = vmatprep.subr.bf16.mxu0 %v1054_v34  ;;  %v246_v61 = vld [vmem:[%s2473_s3 + $0x60] sm:$0xff]  ;;  %1069 = vmatpush1.bf16.msra.mxu1 %v1068_v49  ;;  %v1072_v62 = vpack.c.bf16 %v60_v54, %v56_v53  ;;  %v251_v63 = vld [vmem:[%s2473_s3 + $0x88] sm:$0xff]  ;;  %v1186_v1 = vpack.c.bf16 %v241_v57, %v237_v56  ;;  %v236_v2 = vld [vmem:[%s2473_s3 + $0x10] sm:$0xff] }
  0x10   :  { %v255_v0 = vld [vmem:[%s2473_s3 + $0xa8] sm:$0xff]  ;;  %1071 = vmatprep.subr.bf16.mxu1 %v1070_v52  ;;  %v240_v3 = vld [vmem:[%s2473_s3 + $0x30] sm:$0xff]  ;;  %v245_v4 = vld [vmem:[%s2473_s3 + $0x58] sm:$0xff]  ;;  %v1080_v6 = vpack.c.bf16 %v246_v61, %v242_v60 }
  0x11   :  { %v249_v5 = vld [vmem:[%s2473_s3 + $0x78] sm:$0xff]  ;;  %v1082_v7 = vpack.c.bf16 %v255_v0, %v251_v63  ;;  %v250_v8 = vld [vmem:[%s2473_s3 + $0x80] sm:$0xff]  ;;  %v1188_v10 = vpack.c.bf16 %v240_v3, %v236_v2  ;;  %v259_v11 = vld [vmem:[%s2473_s3 + $0xc8] sm:$0xff] }
  0x12   :  { %1057 = vmatpush1.bf16.msra.mxu0 %v1056_v43  ;;  %v254_v9 = vld [vmem:[%s2473_s3 + $0xa0] sm:$0xff]  ;;  %v263_v12 = vld [vmem:[%s2473_s3 + $0xe8] sm:$0xff]  ;;  %v1190_v13 = vpack.c.bf16 %v249_v5, %v245_v4  ;;  %v244_v14 = vld [vmem:[%s2473_s3 + $0x50] sm:$0xff] }
  0x13   :  { %1075 = vmatprep.subr.bf16.mxu0 %v1074_v46  ;;  %1073 = vmatpush1.bf16.msra.mxu1 %v1072_v62  ;;  %v248_v15 = vld [vmem:[%s2473_s3 + $0x70] sm:$0xff]  ;;  %v253_v16 = vld [vmem:[%s2473_s3 + $0x98] sm:$0xff]  ;;  %v1084_v18 = vpack.c.bf16 %v254_v9, %v250_v8  ;;  %v1086_v19 = vpack.c.bf16 %v263_v12, %v259_v11  ;;  %v258_v20 = vld [vmem:[%s2473_s3 + $0xc0] sm:$0xff] }
  0x14   :  { %1187 = vmatprep.subr.bf16.mxu1 %v1186_v1  ;;  %v257_v17 = vld [vmem:[%s2473_s3 + $0xb8] sm:$0xff]  ;;  %v262_v21 = vld [vmem:[%s2473_s3 + $0xe0] sm:$0xff]  ;;  %v1192_v22 = vpack.c.bf16 %v248_v15, %v244_v14  ;;  %v267_v23 = vld [vmem:[%s2473_s3 + $0x108] sm:$0xff] }
  0x15   :  { %1001 = vmatmul.mubr.msk.f32.vlgmr.msra.gmra.mrb[0].mxu0 %vm84_vm0, %v29_v55  ;;  %v271_v24 = vld [vmem:[%s2473_s3 + $0x128] sm:$0xff]  ;;  %v1194_v25 = vpack.c.bf16 %v257_v17, %v253_v16  ;;  %v252_v26 = vld [vmem:[%s2473_s3 + $0x90] sm:$0xff]  ;;  %v261_v28 = vld [vmem:[%s2473_s3 + $0xd8] sm:$0xff]  ;;  %v1088_v30 = vpack.c.bf16 %v262_v21, %v258_v20 }
  0x16   :  { %1077 = vmatpush1.bf16.msra.mxu0 %v1076_v58  ;;  %1002 = vmatmul.mubr.msk.f32.vlgmr.msra.gmra.mrb[0].mxu1 %vm84_vm0, %v29_v55  ;;  %v256_v27 = vld [vmem:[%s2473_s3 + $0xb0] sm:$0xff]  ;;  %v265_v29 = vld [vmem:[%s2473_s3 + $0xf8] sm:$0xff]  ;;  %v1090_v31 = vpack.c.bf16 %v271_v24, %v267_v23  ;;  %v266_v32 = vld [vmem:[%s2473_s3 + $0x100] sm:$0xff] }
  0x17   :  { %1079 = vmatprep.subr.bf16.mxu0 %v1078_v59  ;;  %1189 = vmatpush1.bf16.msra.mxu1 %v1188_v10  ;;  %v270_v33 = vld [vmem:[%s2473_s3 + $0x120] sm:$0xff]  ;;  %v1196_v34 = vpack.c.bf16 %v256_v27, %v252_v26  ;;  %v275_v35 = vld [vmem:[%s2473_s3 + $0x148] sm:$0xff]  ;;  %v1198_v37 = vpack.c.bf16 %v265_v29, %v261_v28  ;;  %v260_v38 = vld [vmem:[%s2473_s3 + $0xd0] sm:$0xff] }
  0x18   :  { %1191 = vmatprep.subr.bf16.mxu1 %v1190_v13  ;;  %v279_v36 = vld [vmem:[%s2473_s3 + $0x168] sm:$0xff]  ;;  %v264_v39 = vld [vmem:[%s2473_s3 + $0xf0] sm:$0xff]  ;;  %v269_v40 = vld [vmem:[%s2473_s3 + $0x118] sm:$0xff]  ;;  %v1092_v42 = vpack.c.bf16 %v270_v33, %v266_v32 }
  0x19   :  { %v273_v41 = vld [vmem:[%s2473_s3 + $0x138] sm:$0xff]  ;;  %v1094_v43 = vpack.c.bf16 %v279_v36, %v275_v35  ;;  %v274_v44 = vld [vmem:[%s2473_s3 + $0x140] sm:$0xff]  ;;  %v1200_v46 = vpack.c.bf16 %v264_v39, %v260_v38  ;;  %v283_v47 = vld [vmem:[%s2473_s3 + $0x188] sm:$0xff] }
  0x1a   :  { %1081 = vmatpush1.bf16.msra.mxu0 %v1080_v6  ;;  %v278_v45 = vld [vmem:[%s2473_s3 + $0x160] sm:$0xff]  ;;  %v287_v48 = vld [vmem:[%s2473_s3 + $0x1a8] sm:$0xff]  ;;  %v1202_v49 = vpack.c.bf16 %v273_v41, %v269_v40  ;;  %v268_v50 = vld [vmem:[%s2473_s3 + $0x110] sm:$0xff] }
  0x1b   :  { %1083 = vmatprep.subr.bf16.mxu0 %v1082_v7  ;;  %1193 = vmatpush1.bf16.msra.mxu1 %v1192_v22  ;;  %v272_v51 = vld [vmem:[%s2473_s3 + $0x130] sm:$0xff]  ;;  %v277_v52 = vld [vmem:[%s2473_s3 + $0x158] sm:$0xff]  ;;  %v1096_v54 = vpack.c.bf16 %v278_v45, %v274_v44  ;;  %v1098_v55 = vpack.c.bf16 %v287_v48, %v283_v47  ;;  %v282_v56 = vld [vmem:[%s2473_s3 + $0x180] sm:$0xff] }
  0x1c   :  { %1195 = vmatprep.subr.bf16.mxu1 %v1194_v25  ;;  %v281_v53 = vld [vmem:[%s2473_s3 + $0x178] sm:$0xff]  ;;  %v286_v57 = vld [vmem:[%s2473_s3 + $0x1a0] sm:$0xff]  ;;  %v1204_v58 = vpack.c.bf16 %v272_v51, %v268_v50  ;;  %v291_v59 = vld [vmem:[%s2473_s3 + $0x1c8] sm:$0xff] }
  0x1d   :  { %v295_v60 = vld [vmem:[%s2473_s3 + $0x1e8] sm:$0xff]  ;;  %v1206_v61 = vpack.c.bf16 %v281_v53, %v277_v52  ;;  %v276_v62 = vld [vmem:[%s2473_s3 + $0x150] sm:$0xff]  ;;  %v285_v0 = vld [vmem:[%s2473_s3 + $0x198] sm:$0xff]  ;;  %v1100_v2 = vpack.c.bf16 %v286_v57, %v282_v56 }
  0x1e   :  { %1085 = vmatpush1.bf16.msra.mxu0 %v1084_v18  ;;  %v280_v63 = vld [vmem:[%s2473_s3 + $0x170] sm:$0xff]  ;;  %v289_v1 = vld [vmem:[%s2473_s3 + $0x1b8] sm:$0xff]  ;;  %v1102_v3 = vpack.c.bf16 %v295_v60, %v291_v59  ;;  %v290_v4 = vld [vmem:[%s2473_s3 + $0x1c0] sm:$0xff] }
  0x1f   :  { %1087 = vmatprep.subr.bf16.mxu0 %v1086_v19  ;;  %1197 = vmatpush1.bf16.msra.mxu1 %v1196_v34  ;;  %v294_v5 = vld [vmem:[%s2473_s3 + $0x1e0] sm:$0xff]  ;;  %v1208_v6 = vpack.c.bf16 %v280_v63, %v276_v62  ;;  %v299_v7 = vld [vmem:[%s2473_s3 + $0x208] sm:$0xff]  ;;  %v1210_v9 = vpack.c.bf16 %v289_v1, %v285_v0  ;;  %v284_v10 = vld [vmem:[%s2473_s3 + $0x190] sm:$0xff] }
  0x20   :  { %1199 = vmatprep.subr.bf16.mxu1 %v1198_v37  ;;  %v303_v8 = vld [vmem:[%s2473_s3 + $0x228] sm:$0xff]  ;;  %v288_v11 = vld [vmem:[%s2473_s3 + $0x1b0] sm:$0xff]  ;;  %v293_v12 = vld [vmem:[%s2473_s3 + $0x1d8] sm:$0xff]  ;;  %v1104_v14 = vpack.c.bf16 %v294_v5, %v290_v4 }
  0x21   :  { %v297_v13 = vld [vmem:[%s2473_s3 + $0x1f8] sm:$0xff]  ;;  %v1106_v15 = vpack.c.bf16 %v303_v8, %v299_v7  ;;  %v298_v16 = vld [vmem:[%s2473_s3 + $0x200] sm:$0xff]  ;;  %v1212_v18 = vpack.c.bf16 %v288_v11, %v284_v10  ;;  %v307_v19 = vld [vmem:[%s2473_s3 + $0x248] sm:$0xff] }
  0x22   :  { %1089 = vmatpush1.bf16.msra.mxu0 %v1088_v30  ;;  %v302_v17 = vld [vmem:[%s2473_s3 + $0x220] sm:$0xff]  ;;  %v311_v20 = vld [vmem:[%s2473_s3 + $0x268] sm:$0xff]  ;;  %v1214_v21 = vpack.c.bf16 %v297_v13, %v293_v12  ;;  %v292_v22 = vld [vmem:[%s2473_s3 + $0x1d0] sm:$0xff] }
  0x23   :  { %1091 = vmatprep.subr.bf16.mxu0 %v1090_v31  ;;  %1201 = vmatpush1.bf16.msra.mxu1 %v1200_v46  ;;  %v296_v23 = vld [vmem:[%s2473_s3 + $0x1f0] sm:$0xff]  ;;  %v301_v24 = vld [vmem:[%s2473_s3 + $0x218] sm:$0xff]  ;;  %v1108_v26 = vpack.c.bf16 %v302_v17, %v298_v16  ;;  %v1110_v27 = vpack.c.bf16 %v311_v20, %v307_v19  ;;  %v306_v28 = vld [vmem:[%s2473_s3 + $0x240] sm:$0xff] }
  0x24   :  { %1203 = vmatprep.subr.bf16.mxu1 %v1202_v49  ;;  %v305_v25 = vld [vmem:[%s2473_s3 + $0x238] sm:$0xff]  ;;  %v310_v29 = vld [vmem:[%s2473_s3 + $0x260] sm:$0xff]  ;;  %v1216_v30 = vpack.c.bf16 %v296_v23, %v292_v22  ;;  %v315_v31 = vld [vmem:[%s2473_s3 + $0x288] sm:$0xff] }
  0x25   :  { %v319_v32 = vld [vmem:[%s2473_s3 + $0x2a8] sm:$0xff]  ;;  %v1218_v33 = vpack.c.bf16 %v305_v25, %v301_v24  ;;  %v300_v34 = vld [vmem:[%s2473_s3 + $0x210] sm:$0xff] }
  0x26   :  { %1093 = vmatpush1.bf16.msra.mxu0 %v1092_v42  ;;  %v304_v35 = vld [vmem:[%s2473_s3 + $0x230] sm:$0xff] }
  0x27   :  { %1095 = vmatprep.subr.bf16.mxu0 %v1094_v43  ;;  %1205 = vmatpush1.bf16.msra.mxu1 %v1204_v58 }
  0x28   :  { %1207 = vmatprep.subr.bf16.mxu1 %v1206_v61 }
  0x2a   :  { %1097 = vmatpush1.bf16.msra.mxu0 %v1096_v54 }
  0x2b   :  { %1099 = vmatprep.subr.bf16.mxu0 %v1098_v55  ;;  %1209 = vmatpush1.bf16.msra.mxu1 %v1208_v6 }
  0x2c   :  { %1211 = vmatprep.subr.bf16.mxu1 %v1210_v9 }
  0x2e   :  { %1101 = vmatpush1.bf16.msra.mxu0 %v1100_v2 }
  0x2f   :  { %1103 = vmatprep.subr.bf16.mxu0 %v1102_v3  ;;  %1213 = vmatpush1.bf16.msra.mxu1 %v1212_v18 }
  0x30   :  { %1215 = vmatprep.subr.bf16.mxu1 %v1214_v21 }
  0x32   :  { %1105 = vmatpush1.bf16.msra.mxu0 %v1104_v14 }
  0x33   :  { %1107 = vmatprep.subr.bf16.mxu0 %v1106_v15 }
  0x34   :  { %14 = vsyncpa [#allocation3], 0  ;;  %v309_v36 = vld [vmem:[%s2473_s3 + $0x258] sm:$0xff]  ;;  %v1112_v38 = vpack.c.bf16 %v310_v29, %v306_v28  ;;  %v1114_v39 = vpack.c.bf16 %v319_v32, %v315_v31  ;;  %v314_v40 = vld [vmem:[%s2473_s3 + $0x280] sm:$0xff]  ;;  %1217 = vmatpush1.bf16.msra.mxu1 %v1216_v30  ;;  %v1220_v42 = vpack.c.bf16 %v304_v35, %v300_v34  ;;  %s1403_s30 = smov [#allocation2]   ;;  %vm981_vm1 = vcmask 113664  }
  0x35   :  { %v313_v37 = vld [vmem:[%s2473_s3 + $0x278] sm:$0xff]  ;;  %v318_v41 = vld [vmem:[%s2473_s3 + $0x2a0] sm:$0xff]  ;;  %v323_v43 = vld [vmem:[%s2473_s3 + $0x2c8] sm:$0xff]  ;;  %1219 = vmatprep.subr.bf16.mxu1 %v1218_v33  ;;  %s991_s9 = sshll.u32 %s1403_s30, 4  ;;  %s992_s9 = int_to_ptr.vmem [resolvable:$true] %s991_s9 }
  0x36   :  { %1109 = vmatpush1.bf16.msra.mxu0 %v1108_v26  ;;  %v327_v44 = vld [vmem:[%s2473_s3 + $0x2e8] sm:$0xff]  ;;  %v1222_v45 = vpack.c.bf16 %v313_v37, %v309_v36  ;;  %v308_v46 = vld [vmem:[%s2473_s3 + $0x250] sm:$0xff]  ;;  %v317_v48 = vld [vmem:[%s2473_s3 + $0x298] sm:$0xff]  ;;  %v1116_v50 = vpack.c.bf16 %v318_v41, %v314_v40  ;;  %p1382_p1 = scmp.lt.s32.totalorder %s992_s9, %s992_s9 }
  0x37   :  { %1111 = vmatprep.subr.bf16.mxu0 %v1110_v27  ;;  %v312_v47 = vld [vmem:[%s2473_s3 + $0x270] sm:$0xff]  ;;  %v321_v49 = vld [vmem:[%s2473_s3 + $0x2b8] sm:$0xff]  ;;  %v1118_v51 = vpack.c.bf16 %v327_v44, %v323_v43  ;;  %v322_v52 = vld [vmem:[%s2473_s3 + $0x2c0] sm:$0xff] }
  0x38   :  { %v326_v53 = vld [vmem:[%s2473_s3 + $0x2e0] sm:$0xff]  ;;  %1221 = vmatpush1.bf16.msra.mxu1 %v1220_v42  ;;  %v1224_v54 = vpack.c.bf16 %v312_v47, %v308_v46  ;;  %v331_v55 = vld [vmem:[%s2473_s3 + $0x308] sm:$0xff]  ;;  %v1226_v57 = vpack.c.bf16 %v321_v49, %v317_v48  ;;  %v316_v58 = vld [vmem:[%s2473_s3 + $0x290] sm:$0xff] }
  0x39   :  { %v335_v56 = vld [vmem:[%s2473_s3 + $0x328] sm:$0xff]  ;;  %1223 = vmatprep.subr.bf16.mxu1 %v1222_v45  ;;  %v320_v59 = vld [vmem:[%s2473_s3 + $0x2b0] sm:$0xff]  ;;  %v325_v60 = vld [vmem:[%s2473_s3 + $0x2d8] sm:$0xff]  ;;  %v1120_v62 = vpack.c.bf16 %v326_v53, %v322_v52 }
  0x3a   :  { %1113 = vmatpush1.bf16.msra.mxu0 %v1112_v38  ;;  %v329_v61 = vld [vmem:[%s2473_s3 + $0x2f8] sm:$0xff]  ;;  %v1122_v63 = vpack.c.bf16 %v335_v56, %v331_v55  ;;  %v330_v0 = vld [vmem:[%s2473_s3 + $0x300] sm:$0xff]  ;;  %v1228_v2 = vpack.c.bf16 %v320_v59, %v316_v58  ;;  %v339_v3 = vld [vmem:[%s2473_s3 + $0x348] sm:$0xff]  ;;  %v64_v56 = vlaneseq }
  0x3b   :  { %1115 = vmatprep.subr.bf16.mxu0 %v1114_v39  ;;  %v334_v1 = vld [vmem:[%s2473_s3 + $0x320] sm:$0xff]  ;;  %v343_v4 = vld [vmem:[%s2473_s3 + $0x368] sm:$0xff]  ;;  %v1230_v5 = vpack.c.bf16 %v329_v61, %v325_v60  ;;  %v324_v6 = vld [vmem:[%s2473_s3 + $0x2d0] sm:$0xff] }
  0x3c   :  { %1225 = vmatpush1.bf16.msra.mxu1 %v1224_v54  ;;  %v328_v7 = vld [vmem:[%s2473_s3 + $0x2f0] sm:$0xff]  ;;  %v333_v8 = vld [vmem:[%s2473_s3 + $0x318] sm:$0xff]  ;;  %v1124_v10 = vpack.c.bf16 %v334_v1, %v330_v0  ;;  %v1126_v11 = vpack.c.bf16 %v343_v4, %v339_v3  ;;  %v338_v12 = vld [vmem:[%s2473_s3 + $0x340] sm:$0xff] }
  0x3d   :  { %1227 = vmatprep.subr.bf16.mxu1 %v1226_v57  ;;  %v337_v9 = vld [vmem:[%s2473_s3 + $0x338] sm:$0xff]  ;;  %v342_v13 = vld [vmem:[%s2473_s3 + $0x360] sm:$0xff]  ;;  %v1232_v14 = vpack.c.bf16 %v328_v7, %v324_v6  ;;  %v347_v15 = vld [vmem:[%s2473_s3 + $0x388] sm:$0xff]  ;;  %v1946_v57 = vshrl.u32 %v64_v56, 7 }
  0x3e   :  { %1117 = vmatpush1.bf16.msra.mxu0 %v1116_v50  ;;  %v351_v16 = vld [vmem:[%s2473_s3 + $0x3a8] sm:$0xff]  ;;  %v1234_v17 = vpack.c.bf16 %v337_v9, %v333_v8  ;;  %v332_v18 = vld [vmem:[%s2473_s3 + $0x310] sm:$0xff]  ;;  %v341_v20 = vld [vmem:[%s2473_s3 + $0x358] sm:$0xff]  ;;  %v1128_v22 = vpack.c.bf16 %v342_v13, %v338_v12 }
  0x3f   :  { %1119 = vmatprep.subr.bf16.mxu0 %v1118_v51  ;;  %v336_v19 = vld [vmem:[%s2473_s3 + $0x330] sm:$0xff]  ;;  %v345_v21 = vld [vmem:[%s2473_s3 + $0x378] sm:$0xff]  ;;  %v1130_v23 = vpack.c.bf16 %v351_v16, %v347_v15  ;;  %v346_v24 = vld [vmem:[%s2473_s3 + $0x380] sm:$0xff]  ;;  %v66_v58 = vsub.s32 0, %v1946_v57  ;;  %v70_v60 = vsub.s32 1, %v1946_v57 }
  0x40   :  { %1229 = vmatpush1.bf16.msra.mxu1 %v1228_v2  ;;  %v350_v25 = vld [vmem:[%s2473_s3 + $0x3a0] sm:$0xff]  ;;  %v1236_v26 = vpack.c.bf16 %v336_v19, %v332_v18  ;;  %v1238_v27 = vpack.c.bf16 %v345_v21, %v341_v20  ;;  %v340_v28 = vld [vmem:[%s2473_s3 + $0x350] sm:$0xff]  ;;  %v349_v30 = vld [vmem:[%s2473_s3 + $0x398] sm:$0xff]  ;;  %v78_v2 = vsub.s32 3, %v1946_v57 }
  0x41   :  { %1231 = vmatprep.subr.bf16.mxu1 %v1230_v5  ;;  %v344_v29 = vld [vmem:[%s2473_s3 + $0x370] sm:$0xff]  ;;  %v353_v31 = vld [vmem:[%s2473_s3 + $0x3b8] sm:$0xff]  ;;  %v1132_v32 = vpack.c.bf16 %v350_v25, %v346_v24  ;;  %v355_v38 = vld [vmem:[%s2473_s3 + $0x3c8] sm:$0xff] }
  0x42   :  { %1121 = vmatpush1.bf16.msra.mxu0 %v1120_v62  ;;  %v1240_v33 = vpack.c.bf16 %v344_v29, %v340_v28  ;;  %v1242_v34 = vpack.c.bf16 %v353_v31, %v349_v30  ;;  %v348_v35 = vld [vmem:[%s2473_s3 + $0x390] sm:$0xff]  ;;  %v359_v39 = vld [vmem:[%s2473_s3 + $0x3e8] sm:$0xff]  ;;  %v357_v40 = vld [vmem:[%s2473_s3 + $0x3d8] sm:$0xff] }
  0x43   :  { %1123 = vmatprep.subr.bf16.mxu0 %v1122_v63  ;;  %v352_v36 = vld [vmem:[%s2473_s3 + $0x3b0] sm:$0xff]  ;;  %v1134_v41 = vpack.c.bf16 %v359_v39, %v355_v38  ;;  %v361_v42 = vld [vmem:[%s2473_s3 + $0x3f8] sm:$0xff]  ;;  %v354_v43 = vld [vmem:[%s2473_s3 + $0x3c0] sm:$0xff] }
  0x44   :  { %1233 = vmatpush1.bf16.msra.mxu1 %v1232_v14  ;;  %v1244_v37 = vpack.c.bf16 %v352_v36, %v348_v35  ;;  %v358_v44 = vld [vmem:[%s2473_s3 + $0x3e0] sm:$0xff]  ;;  %v1246_v45 = vpack.c.bf16 %v361_v42, %v357_v40  ;;  %v356_v47 = vld [vmem:[%s2473_s3 + $0x3d0] sm:$0xff]  ;;  %v363_v50 = vld [vmem:[%s2473_s3 + $0x408] sm:$0xff] }
  0x45   :  { %1235 = vmatprep.subr.bf16.mxu1 %v1234_v17  ;;  %v1136_v46 = vpack.c.bf16 %v358_v44, %v354_v43  ;;  %v360_v48 = vld [vmem:[%s2473_s3 + $0x3f0] sm:$0xff]  ;;  %v367_v51 = vld [vmem:[%s2473_s3 + $0x428] sm:$0xff]  ;;  %v365_v52 = vld [vmem:[%s2473_s3 + $0x418] sm:$0xff] }
  0x46   :  { %1125 = vmatpush1.bf16.msra.mxu0 %v1124_v10  ;;  %v1248_v49 = vpack.c.bf16 %v360_v48, %v356_v47  ;;  %v1138_v53 = vpack.c.bf16 %v367_v51, %v363_v50  ;;  %v369_v54 = vld [vmem:[%s2473_s3 + $0x438] sm:$0xff]  ;;  %v1952_v59 = vld [vmem:[%s2472_s2] sm:$0xf]  ;;  %v364_v5 = vld [vmem:[%s2473_s3 + $0x410] sm:$0xff] }
  0x47   :  { %1127 = vmatprep.subr.bf16.mxu0 %v1126_v11  ;;  %v1250_v55 = vpack.c.bf16 %v369_v54, %v365_v52  ;;  %v67_v61 = vrot.slane %v1952_v59, %v66_v58  ;;  %v71_v62 = vrot.slane %v1952_v59, %v70_v60  ;;  %v362_v0 = vld [vmem:[%s2473_s3 + $0x400] sm:$0xff]  ;;  %v368_v6 = vld [vmem:[%s2473_s3 + $0x430] sm:$0xff]  ;;  %v371_v7 = vld [vmem:[%s2473_s3 + $0x448] sm:$0xff]  ;;  %v79_v17 = vrot.slane %v1952_v59, %v78_v2 }
  0x48   :  { %1237 = vmatpush1.bf16.msra.mxu1 %v1236_v26  ;;  %v366_v1 = vld [vmem:[%s2473_s3 + $0x420] sm:$0xff]  ;;  %v375_v9 = vld [vmem:[%s2473_s3 + $0x468] sm:$0xff]  ;;  %v373_v10 = vld [vmem:[%s2473_s3 + $0x458] sm:$0xff]  ;;  %v1252_v14 = vpack.c.bf16 %v368_v6, %v364_v5 }
  0x49   :  { %1239 = vmatprep.subr.bf16.mxu1 %v1238_v27  ;;  %v377_v11 = vld [vmem:[%s2473_s3 + $0x478] sm:$0xff]  ;;  %v1140_v13 = vpack.c.bf16 %v366_v1, %v362_v0  ;;  %v370_v15 = vld [vmem:[%s2473_s3 + $0x440] sm:$0xff]  ;;  %v1142_v19 = vpack.c.bf16 %v375_v9, %v371_v7  ;;  %v372_v21 = vld [vmem:[%s2473_s3 + $0x450] sm:$0xff] }
  0x4a   :  { %1129 = vmatpush1.bf16.msra.mxu0 %v1128_v22  ;;  %v374_v16 = vld [vmem:[%s2473_s3 + $0x460] sm:$0xff]  ;;  %v1254_v20 = vpack.c.bf16 %v377_v11, %v373_v10  ;;  %v376_v22 = vld [vmem:[%s2473_s3 + $0x470] sm:$0xff]  ;;  %v383_v24 = vld [vmem:[%s2473_s3 + $0x4a8] sm:$0xff] }
  0x4b   :  { %1131 = vmatprep.subr.bf16.mxu0 %v1130_v23  ;;  %v379_v23 = vld [vmem:[%s2473_s3 + $0x488] sm:$0xff]  ;;  %v381_v25 = vld [vmem:[%s2473_s3 + $0x498] sm:$0xff]  ;;  %v1144_v29 = vpack.c.bf16 %v374_v16, %v370_v15  ;;  %v1256_v30 = vpack.c.bf16 %v376_v22, %v372_v21  ;;  %v378_v31 = vld [vmem:[%s2473_s3 + $0x480] sm:$0xff] }
  0x4c   :  { %1241 = vmatpush1.bf16.msra.mxu1 %v1240_v33  ;;  %v385_v26 = vld [vmem:[%s2473_s3 + $0x4b8] sm:$0xff]  ;;  %v380_v36 = vld [vmem:[%s2473_s3 + $0x490] sm:$0xff]  ;;  %v387_v38 = vld [vmem:[%s2473_s3 + $0x4c8] sm:$0xff] }
  0x4d   :  { %1243 = vmatprep.subr.bf16.mxu1 %v1242_v34  ;;  %v1146_v34 = vpack.c.bf16 %v383_v24, %v379_v23  ;;  %v1258_v35 = vpack.c.bf16 %v385_v26, %v381_v25  ;;  %v391_v39 = vld [vmem:[%s2473_s3 + $0x4e8] sm:$0xff]  ;;  %v389_v40 = vld [vmem:[%s2473_s3 + $0x4d8] sm:$0xff]  ;;  %v392_v50 = vld [vmem:[%s2473_s3 + $0x4f0] sm:$0xff] }
  0x4e   :  { %1133 = vmatpush1.bf16.msra.mxu0 %v1132_v32  ;;  %v382_v32 = vld [vmem:[%s2473_s3 + $0x4a0] sm:$0xff]  ;;  %v1150_v47 = vpack.c.bf16 %v391_v39, %v387_v38  ;;  %v395_v51 = vld [vmem:[%s2473_s3 + $0x508] sm:$0xff]  ;;  %v401_v54 = vld [vmem:[%s2473_s3 + $0x538] sm:$0xff] }
  0x4f   :  { %1135 = vmatprep.subr.bf16.mxu0 %v1134_v41  ;;  %v393_v41 = vld [vmem:[%s2473_s3 + $0x4f8] sm:$0xff]  ;;  %v1148_v43 = vpack.c.bf16 %v382_v32, %v378_v31  ;;  %v399_v52 = vld [vmem:[%s2473_s3 + $0x528] sm:$0xff]  ;;  %v396_v1 = vld [vmem:[%s2473_s3 + $0x510] sm:$0xff] }
  0x50   :  { %1245 = vmatpush1.bf16.msra.mxu1 %v1244_v37  ;;  %v384_v37 = vld [vmem:[%s2473_s3 + $0x4b0] sm:$0xff]  ;;  %v1262_v48 = vpack.c.bf16 %v393_v41, %v389_v40  ;;  %v407_v5 = vld [vmem:[%s2473_s3 + $0x568] sm:$0xff]  ;;  %v405_v6 = vld [vmem:[%s2473_s3 + $0x558] sm:$0xff] }
  0x51   :  { %1247 = vmatprep.subr.bf16.mxu1 %v1246_v45  ;;  %v1260_v44 = vpack.c.bf16 %v384_v37, %v380_v36  ;;  %v386_v45 = vld [vmem:[%s2473_s3 + $0x4c0] sm:$0xff]  ;;  %v409_v7 = vld [vmem:[%s2473_s3 + $0x578] sm:$0xff]  ;;  %v408_v15 = vld [vmem:[%s2473_s3 + $0x570] sm:$0xff] }
  0x52   :  { %1137 = vmatpush1.bf16.msra.mxu0 %v1136_v46  ;;  %v390_v46 = vld [vmem:[%s2473_s3 + $0x4e0] sm:$0xff]  ;;  %v411_v16 = vld [vmem:[%s2473_s3 + $0x588] sm:$0xff]  ;;  %v412_v26 = vld [vmem:[%s2473_s3 + $0x590] sm:$0xff] }
  0x53   :  { %1139 = vmatprep.subr.bf16.mxu0 %v1138_v53  ;;  %v397_v53 = vld [vmem:[%s2473_s3 + $0x518] sm:$0xff]  ;;  %v402_v10 = vld [vmem:[%s2473_s3 + $0x540] sm:$0xff]  ;;  %v420_v39 = vld [vmem:[%s2473_s3 + $0x5d0] sm:$0xff] }
  0x54   :  { %1249 = vmatpush1.bf16.msra.mxu1 %v1248_v49  ;;  %v388_v49 = vld [vmem:[%s2473_s3 + $0x4d0] sm:$0xff]  ;;  %v1266_v0 = vpack.c.bf16 %v401_v54, %v397_v53  ;;  %v406_v11 = vld [vmem:[%s2473_s3 + $0x560] sm:$0xff]  ;;  %v421_v31 = vld [vmem:[%s2473_s3 + $0x5d8] sm:$0xff] }
  0x55   :  { %1251 = vmatprep.subr.bf16.mxu1 %v1250_v55  ;;  %v1152_v55 = vpack.c.bf16 %v390_v46, %v386_v45  ;;  %v1264_v56 = vpack.c.bf16 %v392_v50, %v388_v49  ;;  %v410_v22 = vld [vmem:[%s2473_s3 + $0x580] sm:$0xff]  ;;  %v425_v32 = vld [vmem:[%s2473_s3 + $0x5f8] sm:$0xff]  ;;  %v424_v40 = vld [vmem:[%s2473_s3 + $0x5f0] sm:$0xff] }
  0x56   :  { %v414_v23 = vld [vmem:[%s2473_s3 + $0x5a0] sm:$0xff]  ;;  %v1278_v38 = vpack.c.bf16 %v425_v32, %v421_v31  ;;  %v427_v41 = vld [vmem:[%s2473_s3 + $0x608] sm:$0xff]  ;;  %v1280_v46 = vpack.c.bf16 %v424_v40, %v420_v39  ;;  %v452_v31 = vld [vmem:[%s2473_s3 + $0x6d0] sm:$0xff] }
  0x57   :  { %v422_v36 = vld [vmem:[%s2473_s3 + $0x5e0] sm:$0xff]  ;;  %v435_v53 = vld [vmem:[%s2473_s3 + $0x648] sm:$0xff]  ;;  %v456_v32 = vld [vmem:[%s2473_s3 + $0x6f0] sm:$0xff] }
  0x58   :  { %v439_v54 = vld [vmem:[%s2473_s3 + $0x668] sm:$0xff]  ;;  %v775_v40 = vld [vmem:[%s2475_s5] sm:$0xff] }
  0xe8   :  { %v154_v63 = vpop.f32.mrb[0].mxu0 }
  0xe9   :  { %v155_v3 = vadd.f32 %v154_v63, %v67_v61  ;;  %v156_v4 = vpop.f32.mrb[1].mxu0  ;;  %v2013_v27 = vpop.f32.mrb[0].mxu1  ;;  %v394_v61 = vld [vmem:[%s2473_s3 + $0x500] sm:$0xff]  ;;  %v1154_v63 = vpack.c.bf16 %v399_v52, %v395_v51  ;;  %v428_v51 = vld [vmem:[%s2473_s3 + $0x610] sm:$0xff] }
  0xea   :  { %v157_v8 = vadd.f32 %v156_v4, %v71_v62  ;;  %v227_v28 = vpop.f32.mrb[1].mxu1  ;;  %v398_v62 = vld [vmem:[%s2473_s3 + $0x520] sm:$0xff]  ;;  %v403_v4 = vld [vmem:[%s2473_s3 + $0x548] sm:$0xff]  ;;  %v432_v52 = vld [vmem:[%s2473_s3 + $0x630] sm:$0xff] }
  0xeb   :  { %v230_v18 = vmax.f32 %v155_v3, 0.0  ;;  %v228_v33 = vadd.f32 %v227_v28, %v79_v17  ;;  %v400_v3 = vld [vmem:[%s2473_s3 + $0x530] sm:$0xff]  ;;  %v415_v17 = vld [vmem:[%s2473_s3 + $0x5a8] sm:$0xff] }
  0xec   :  { %v231_v12 = vmax.f32 %v157_v8, 0.0  ;;  %v1156_v8 = vpack.c.bf16 %v398_v62, %v394_v61  ;;  %v1268_v9 = vpack.c.bf16 %v400_v3, %v396_v1  ;;  %v1162_v24 = vpack.c.bf16 %v415_v17, %v411_v16  ;;  %v416_v28 = vld [vmem:[%s2473_s3 + $0x5b0] sm:$0xff] }
  0xed   :  { %v233_v42 = vmax.f32 %v228_v33, 0.0  ;;  %v1164_v33 = vpack.c.bf16 %v414_v23, %v410_v22  ;;  %v1284_v62 = vpack.c.bf16 %v432_v52, %v428_v51  ;;  %v1174_v1 = vpack.c.bf16 %v439_v54, %v435_v53  ;;  %v444_v17 = vld [vmem:[%s2473_s3 + $0x690] sm:$0xff]  ;;  %v457_v22 = vld [vmem:[%s2473_s3 + $0x6f8] sm:$0xff]  ;;  %v795_v52 = vld [vmem:[%s2475_s5 + $0xa0] sm:$0xff] }
  0xee   :  { %547 = vmatprep.mubr.f32.mxu0 %v231_v12  ;;  %689 = vmatprep.mubr.f32.mxu1 %v231_v12  ;;  %v1158_v12 = vpack.c.bf16 %v407_v5, %v403_v4  ;;  %v436_v4 = vld [vmem:[%s2473_s3 + $0x650] sm:$0xff]  ;;  %v778_v51 = vld [vmem:[%s2475_s5 + $0x18] sm:$0xff]  ;;  %v796_v53 = vld [vmem:[%s2475_s5 + $0xa8] sm:$0xff] }
  0xef   :  { %548 = vmatmul.mubr.f32.vlgmr.msra.gmra.mrb[2].mxu0 %v230_v18  ;;  %690 = vmatmul.mubr.f32.vlgmr.msra.gmra.mrb[2].mxu1 %v230_v18  ;;  %v413_v18 = vld [vmem:[%s2473_s3 + $0x598] sm:$0xff]  ;;  %v440_v5 = vld [vmem:[%s2473_s3 + $0x670] sm:$0xff] }
  0xf0   :  { %1141 = vmatpush1.bf16.msra.mxu0 %v1140_v13  ;;  %1253 = vmatpush1.bf16.msra.mxu1 %v1252_v14  ;;  %v1270_v13 = vpack.c.bf16 %v409_v7, %v405_v6  ;;  %v404_v14 = vld [vmem:[%s2473_s3 + $0x550] sm:$0xff]  ;;  %v443_v6 = vld [vmem:[%s2473_s3 + $0x688] sm:$0xff] }
  0xf1   :  { %1143 = vmatprep.subr.bf16.mxu0 %v1142_v19  ;;  %1255 = vmatprep.subr.bf16.mxu1 %v1254_v20  ;;  %v417_v19 = vld [vmem:[%s2473_s3 + $0x5b8] sm:$0xff]  ;;  %v1160_v20 = vpack.c.bf16 %v406_v11, %v402_v10  ;;  %v1272_v21 = vpack.c.bf16 %v408_v15, %v404_v14  ;;  %v447_v7 = vld [vmem:[%s2473_s3 + $0x6a8] sm:$0xff]  ;;  %v1288_v11 = vpack.c.bf16 %v440_v5, %v436_v4  ;;  %v74_v14 = vsub.s32 2, %v1946_v57  ;;  %v813_v5 = vld [vmem:[%s2475_s5 + $0x130] sm:$0xff] }
  0xf2   :  { %1003 = vmatprep.mubr.msk.f32.mxu0 %vm84_vm0, %v233_v42  ;;  %1004 = vmatprep.mubr.msk.f32.mxu1 %vm84_vm0, %v233_v42  ;;  %v1274_v25 = vpack.c.bf16 %v417_v19, %v413_v18  ;;  %v431_v42 = vld [vmem:[%s2473_s3 + $0x628] sm:$0xff]  ;;  %v1178_v15 = vpack.c.bf16 %v447_v7, %v443_v6  ;;  %v448_v18 = vld [vmem:[%s2473_s3 + $0x6b0] sm:$0xff]  ;;  %v814_v7 = vld [vmem:[%s2475_s5 + $0x138] sm:$0xff] }
  0xf3   :  { %v1170_v49 = vpack.c.bf16 %v431_v42, %v427_v41  ;;  %v451_v19 = vld [vmem:[%s2473_s3 + $0x6c8] sm:$0xff]  ;;  %v793_v42 = vld [vmem:[%s2475_s5 + $0x90] sm:$0xff] }
  0xf4   :  { %1145 = vmatpush1.bf16.msra.mxu0 %v1144_v29  ;;  %1257 = vmatpush1.bf16.msra.mxu1 %v1256_v30  ;;  %v419_v29 = vld [vmem:[%s2473_s3 + $0x5c8] sm:$0xff] }
  0xf5   :  { %1147 = vmatprep.subr.bf16.mxu0 %v1146_v34  ;;  %1259 = vmatprep.subr.bf16.mxu1 %v1258_v35  ;;  %v423_v30 = vld [vmem:[%s2473_s3 + $0x5e8] sm:$0xff]  ;;  %v1276_v34 = vpack.c.bf16 %v416_v28, %v412_v26  ;;  %v418_v35 = vld [vmem:[%s2473_s3 + $0x5c0] sm:$0xff]  ;;  %v75_v26 = vrot.slane %v1952_v59, %v74_v14 }
  0xf6   :  { %v1166_v37 = vpack.c.bf16 %v423_v30, %v419_v29  ;;  %v1168_v45 = vpack.c.bf16 %v422_v36, %v418_v35  ;;  %v454_v30 = vld [vmem:[%s2473_s3 + $0x6e0] sm:$0xff]  ;;  %v1296_v35 = vpack.c.bf16 %v456_v32, %v452_v31  ;;  %v776_v41 = vld [vmem:[%s2475_s5 + $0x8] sm:$0xff] }
  0xf7   :  { %v791_v59 = vld [vmem:[%s2475_s5 + $0x80] sm:$0xff]  ;;  %v804_v32 = vld [vmem:[%s2475_s5 + $0xe8] sm:$0xff] }
  0xf8   :  { %1149 = vmatpush1.bf16.msra.mxu0 %v1148_v43  ;;  %1261 = vmatpush1.bf16.msra.mxu1 %v1260_v44  ;;  %v429_v43 = vld [vmem:[%s2473_s3 + $0x618] sm:$0xff]  ;;  %v807_v36 = vld [vmem:[%s2475_s5 + $0x100] sm:$0xff] }
  0xf9   :  { %1151 = vmatprep.subr.bf16.mxu0 %v1150_v47  ;;  %1263 = vmatprep.subr.bf16.mxu1 %v1262_v48  ;;  %v433_v44 = vld [vmem:[%s2473_s3 + $0x638] sm:$0xff]  ;;  %v426_v47 = vld [vmem:[%s2473_s3 + $0x600] sm:$0xff] }
  0xfa   :  { %v430_v48 = vld [vmem:[%s2473_s3 + $0x620] sm:$0xff]  ;;  %v1282_v50 = vpack.c.bf16 %v433_v44, %v429_v43  ;;  %v809_v44 = vld [vmem:[%s2475_s5 + $0x110] sm:$0xff] }
  0xfb   :  { %v1172_v61 = vpack.c.bf16 %v430_v48, %v426_v47  ;;  %v1402_v47 = vmov 0.0|0.0   ;;  %v810_v48 = vld [vmem:[%s2475_s5 + $0x118] sm:$0xff]  ;;  %v803_v31 = vld [vmem:[%s2475_s5 + $0xe0] sm:$0xff] }
  0xfc   :  { %1153 = vmatpush1.bf16.msra.mxu0 %v1152_v55  ;;  %1265 = vmatpush1.bf16.msra.mxu1 %v1264_v56  ;;  %v437_v55 = vld [vmem:[%s2473_s3 + $0x658] sm:$0xff]  ;;  %v1334_v54 = vpack.c.bf16 %v810_v48, %v809_v44  ;;  %v788_v48 = vld [vmem:[%s2475_s5 + $0x68] sm:$0xff] }
  0xfd   :  { %1155 = vmatprep.subr.bf16.mxu0 %v1154_v63  ;;  %1267 = vmatprep.subr.bf16.mxu1 %v1266_v0  ;;  %v441_v56 = vld [vmem:[%s2473_s3 + $0x678] sm:$0xff]  ;;  %v434_v63 = vld [vmem:[%s2473_s3 + $0x640] sm:$0xff] }
  0xfe   :  { %v438_v0 = vld [vmem:[%s2473_s3 + $0x660] sm:$0xff]  ;;  %v1286_v3 = vpack.c.bf16 %v441_v56, %v437_v55  ;;  %v826_v44 = vld [vmem:[%s2475_s5 + $0x198] sm:$0xff] }
  0xff   :  { %v1176_v10 = vpack.c.bf16 %v438_v0, %v434_v63  ;;  %v811_v55 = vld [vmem:[%s2475_s5 + $0x120] sm:$0xff]  ;;  %v780_v0 = vld [vmem:[%s2475_s5 + $0x28] sm:$0xff] }
 0x100   :  { %1157 = vmatpush1.bf16.msra.mxu0 %v1156_v8  ;;  %1269 = vmatpush1.bf16.msra.mxu1 %v1268_v9  ;;  %v445_v8 = vld [vmem:[%s2473_s3 + $0x698] sm:$0xff]  ;;  %v779_v63 = vld [vmem:[%s2475_s5 + $0x20] sm:$0xff] }
 0x101   :  { %1159 = vmatprep.subr.bf16.mxu0 %v1158_v12  ;;  %1271 = vmatprep.subr.bf16.mxu1 %v1270_v13  ;;  %v449_v9 = vld [vmem:[%s2473_s3 + $0x6b8] sm:$0xff]  ;;  %v442_v12 = vld [vmem:[%s2473_s3 + $0x680] sm:$0xff]  ;;  %v1308_v6 = vpack.c.bf16 %v780_v0, %v779_v63 }
 0x102   :  { %v446_v13 = vld [vmem:[%s2473_s3 + $0x6a0] sm:$0xff]  ;;  %v1290_v16 = vpack.c.bf16 %v449_v9, %v445_v8  ;;  %v781_v9 = vld [vmem:[%s2475_s5 + $0x30] sm:$0xff]  ;;  %v830_v0 = vld [vmem:[%s2475_s5 + $0x1b8] sm:$0xff] }
 0x103   :  { %v1180_v23 = vpack.c.bf16 %v446_v13, %v442_v12  ;;  %v800_v12 = vld [vmem:[%s2475_s5 + $0xc8] sm:$0xff]  ;;  %v1340_v13 = vpack.c.bf16 %v814_v7, %v813_v5 }
 0x104   :  { %1161 = vmatpush1.bf16.msra.mxu0 %v1160_v20  ;;  %1273 = vmatpush1.bf16.msra.mxu1 %v1272_v21  ;;  %v455_v20 = vld [vmem:[%s2473_s3 + $0x6e8] sm:$0xff]  ;;  %v453_v21 = vld [vmem:[%s2473_s3 + $0x6d8] sm:$0xff] }
 0x105   :  { %1163 = vmatprep.subr.bf16.mxu0 %v1162_v24  ;;  %1275 = vmatprep.subr.bf16.mxu1 %v1274_v25  ;;  %v1292_v24 = vpack.c.bf16 %v448_v18, %v444_v17  ;;  %v450_v25 = vld [vmem:[%s2473_s3 + $0x6c0] sm:$0xff]  ;;  %v1182_v28 = vpack.c.bf16 %v455_v20, %v451_v19  ;;  %v1294_v29 = vpack.c.bf16 %v457_v22, %v453_v21  ;;  %v816_v17 = vld [vmem:[%s2475_s5 + $0x148] sm:$0xff]  ;;  %v801_v21 = vld [vmem:[%s2475_s5 + $0xd0] sm:$0xff] }
 0x106   :  { %v783_v19 = vld [vmem:[%s2475_s5 + $0x40] sm:$0xff]  ;;  %v784_v20 = vld [vmem:[%s2475_s5 + $0x48] sm:$0xff]  ;;  %v802_v22 = vld [vmem:[%s2475_s5 + $0xd8] sm:$0xff] }
 0x108   :  { %1165 = vmatpush1.bf16.msra.mxu0 %v1164_v33  ;;  %1277 = vmatpush1.bf16.msra.mxu1 %v1276_v34  ;;  %v792_v33 = vld [vmem:[%s2475_s5 + $0x88] sm:$0xff]  ;;  %v1184_v34 = vpack.c.bf16 %v454_v30, %v450_v25  ;;  %v1316_v25 = vpack.c.bf16 %v784_v20, %v783_v19  ;;  %v786_v30 = vld [vmem:[%s2475_s5 + $0x58] sm:$0xff] }
 0x109   :  { %1167 = vmatprep.subr.bf16.mxu0 %v1166_v37  ;;  %1279 = vmatprep.subr.bf16.mxu1 %v1278_v38  ;;  %v226_v37 = vadd.f32 %v2013_v27, %v75_v26  ;;  %v808_v38 = vld [vmem:[%s2475_s5 + $0x108] sm:$0xff]  ;;  %v1298_v39 = vpack.c.bf16 %v792_v33, %v791_v59  ;;  %v794_v27 = vld [vmem:[%s2475_s5 + $0x98] sm:$0xff] }
 0x10a   :  { %v1331_v43 = vpack.c.bf16 %v808_v38, %v807_v36  ;;  %v818_v26 = vld [vmem:[%s2475_s5 + $0x158] sm:$0xff]  ;;  %v1322_v36 = vpack.c.bf16 %v804_v32, %v803_v31  ;;  %v821_v38 = vld [vmem:[%s2475_s5 + $0x170] sm:$0xff] }
 0x10c   :  { %1169 = vmatpush1.bf16.msra.mxu0 %v1168_v45  ;;  %1281 = vmatpush1.bf16.msra.mxu1 %v1280_v46  ;;  %v1300_v45 = vpack.c.bf16 %v776_v41, %v775_v40  ;;  %v232_v46 = vmax.f32 %v226_v37, 0.0  ;;  %v823_v41 = vld [vmem:[%s2475_s5 + $0x180] sm:$0xff] }
 0x10d   :  { %1171 = vmatprep.subr.bf16.mxu0 %v1170_v49  ;;  %1283 = vmatprep.subr.bf16.mxu1 %v1282_v50  ;;  %v1302_v49 = vpack.c.bf16 %v794_v27, %v793_v42  ;;  %v777_v50 = vld [vmem:[%s2475_s5 + $0x10] sm:$0xff]  ;;  %v824_v42 = vld [vmem:[%s2475_s5 + $0x188] sm:$0xff] }
 0x10e   :  { %v1304_v56 = vpack.c.bf16 %v778_v51, %v777_v50  ;;  %v1355_v27 = vpack.c.bf16 %v824_v42, %v823_v41  ;;  %v828_v51 = vld [vmem:[%s2475_s5 + $0x1a8] sm:$0xff] }
 0x110   :  { %1173 = vmatpush1.bf16.msra.mxu0 %v1172_v61  ;;  %1285 = vmatpush1.bf16.msra.mxu1 %v1284_v62  ;;  %v812_v61 = vld [vmem:[%s2475_s5 + $0x128] sm:$0xff]  ;;  %v1306_v62 = vpack.c.bf16 %v796_v53, %v795_v52  ;;  %v805_v53 = vld [vmem:[%s2475_s5 + $0xf0] sm:$0xff] }
 0x111   :  { %1175 = vmatprep.subr.bf16.mxu0 %v1174_v1  ;;  %1287 = vmatprep.subr.bf16.mxu1 %v1286_v3  ;;  %v797_v1 = vld [vmem:[%s2475_s5 + $0xb0] sm:$0xff]  ;;  %v798_v3 = vld [vmem:[%s2475_s5 + $0xb8] sm:$0xff]  ;;  %v1337_v4 = vpack.c.bf16 %v812_v61, %v811_v55 }
 0x112   :  { %v1310_v8 = vpack.c.bf16 %v798_v3, %v797_v1  ;;  %v790_v61 = vld [vmem:[%s2475_s5 + $0x78] sm:$0xff]  ;;  %v458_v3 = vld [vmem:[%s2474_s4] sm:$0xf] }
 0x113   :  { %v471_v5 = vrot.slane %v458_v3, %v74_v14 }
 0x114   :  { %1177 = vmatpush1.bf16.msra.mxu0 %v1176_v10  ;;  %1289 = vmatpush1.bf16.msra.mxu1 %v1288_v11  ;;  %v782_v10 = vld [vmem:[%s2475_s5 + $0x38] sm:$0xff]  ;;  %v799_v11 = vld [vmem:[%s2475_s5 + $0xc0] sm:$0xff] }
 0x115   :  { %1179 = vmatprep.subr.bf16.mxu0 %v1178_v15  ;;  %1291 = vmatprep.subr.bf16.mxu1 %v1290_v16  ;;  %v815_v15 = vld [vmem:[%s2475_s5 + $0x140] sm:$0xff]  ;;  %v1312_v16 = vpack.c.bf16 %v782_v10, %v781_v9  ;;  %v1314_v18 = vpack.c.bf16 %v800_v12, %v799_v11 }
 0x118   :  { %1181 = vmatpush1.bf16.msra.mxu0 %v1180_v23  ;;  %1293 = vmatpush1.bf16.msra.mxu1 %v1292_v24  ;;  %v1343_v23 = vpack.c.bf16 %v816_v17, %v815_v15  ;;  %v817_v24 = vld [vmem:[%s2475_s5 + $0x150] sm:$0xff] }
 0x119   :  { %1183 = vmatprep.subr.bf16.mxu0 %v1182_v28  ;;  %1295 = vmatprep.subr.bf16.mxu1 %v1294_v29  ;;  %v1318_v28 = vpack.c.bf16 %v802_v22, %v801_v21  ;;  %v785_v29 = vld [vmem:[%s2475_s5 + $0x50] sm:$0xff]  ;;  %v1346_v59 = vpack.c.bf16 %v818_v26, %v817_v24 }
 0x11a   :  { %v1320_v33 = vpack.c.bf16 %v786_v30, %v785_v29 }
 0x11c   :  { %1185 = vmatpush1.bf16.msra.mxu0 %v1184_v34  ;;  %1297 = vmatpush1.bf16.msra.mxu1 %v1296_v35  ;;  %v819_v34 = vld [vmem:[%s2475_s5 + $0x160] sm:$0xff]  ;;  %v820_v35 = vld [vmem:[%s2475_s5 + $0x168] sm:$0xff] }
 0x11d   :  { %1330 = vmatprep.subr.bf16.mxu1 %v1402_v47  ;;  %1299 = vmatprep.subr.bf16.mxu0 %v1298_v39  ;;  %v1349_v37 = vpack.c.bf16 %v820_v35, %v819_v34  ;;  %v822_v39 = vld [vmem:[%s2475_s5 + $0x178] sm:$0xff] }
 0x11e   :  { %v1352_v40 = vpack.c.bf16 %v822_v39, %v821_v38 }
 0x11f   :  { %619 = vmatmul.mubr.f32.vlgmr.msra.gmra.mrb[2].mxu0 %v232_v46  ;;  %761 = vmatmul.mubr.f32.vlgmr.msra.gmra.mrb[2].mxu1 %v232_v46  ;;  %v787_v46 = vld [vmem:[%s2475_s5 + $0x60] sm:$0xff] }
 0x120   :  { %1332 = vmatpush1.bf16.msra.mxu1 %v1331_v43  ;;  %1301 = vmatpush3.bf16.msra.mxu0 %v1300_v45  ;;  %v825_v43 = vld [vmem:[%s2475_s5 + $0x190] sm:$0xff]  ;;  %v1324_v50 = vpack.c.bf16 %v788_v48, %v787_v46 }
 0x121   :  { %1333 = vmatprep.subr.bf16.mxu1 %v1402_v47  ;;  %1303 = vmatprep.subr.bf16.mxu0 %v1302_v49  ;;  %v1358_v45 = vpack.c.bf16 %v826_v44, %v825_v43  ;;  %v827_v49 = vld [vmem:[%s2475_s5 + $0x1a0] sm:$0xff] }
 0x122   :  { %v1361_v52 = vpack.c.bf16 %v828_v51, %v827_v49 }
 0x124   :  { %1335 = vmatpush1.bf16.msra.mxu1 %v1334_v54  ;;  %1305 = vmatpush3.bf16.msra.mxu0 %v1304_v56  ;;  %v806_v54 = vld [vmem:[%s2475_s5 + $0xf8] sm:$0xff]  ;;  %v789_v56 = vld [vmem:[%s2475_s5 + $0x70] sm:$0xff] }
 0x125   :  { %1336 = vmatprep.subr.bf16.mxu1 %v1402_v47  ;;  %1307 = vmatprep.subr.bf16.mxu0 %v1306_v62  ;;  %v1326_v55 = vpack.c.bf16 %v806_v54, %v805_v53  ;;  %v829_v62 = vld [vmem:[%s2475_s5 + $0x1b0] sm:$0xff]  ;;  %v1328_v63 = vpack.c.bf16 %v790_v61, %v789_v56 }
 0x126   :  { %v1364_v1 = vpack.c.bf16 %v830_v0, %v829_v62 }
 0x128   :  { %1338 = vmatpush1.bf16.msra.mxu1 %v1337_v4  ;;  %1309 = vmatpush3.bf16.msra.mxu0 %v1308_v6  ;;  %v463_v4 = vrot.slane %v458_v3, %v66_v58  ;;  %v475_v6 = vrot.slane %v458_v3, %v78_v2  ;;  %v1005_v2 = vld [vmem:[%s2476_s6] ss:$0 sm:$0xff] }
 0x129   :  { %1339 = vmatprep.subr.bf16.mxu1 %v1402_v47  ;;  %1311 = vmatprep.subr.bf16.mxu0 %v1310_v8 }
 0x12c   :  { %1341 = vmatpush1.bf16.msra.mxu1 %v1340_v13  ;;  %1313 = vmatpush3.bf16.msra.mxu0 %v1312_v16 }
 0x12d   :  { %1342 = vmatprep.subr.bf16.mxu1 %v1402_v47  ;;  %1315 = vmatprep.subr.bf16.mxu0 %v1314_v18 }
 0x130   :  { %1344 = vmatpush1.bf16.msra.mxu1 %v1343_v23  ;;  %1317 = vmatpush3.bf16.msra.mxu0 %v1316_v25 }
 0x131   :  { %1345 = vmatprep.subr.bf16.mxu1 %v1402_v47  ;;  %1319 = vmatprep.subr.bf16.mxu0 %v1318_v28 }
 0x134   :  { %1347 = vmatpush1.bf16.msra.mxu1 %v1346_v59  ;;  %1321 = vmatpush3.bf16.msra.mxu0 %v1320_v33 }
 0x135   :  { %1348 = vmatprep.subr.bf16.mxu1 %v1402_v47  ;;  %1323 = vmatprep.subr.bf16.mxu0 %v1322_v36 }
 0x138   :  { %1350 = vmatpush1.bf16.msra.mxu1 %v1349_v37  ;;  %1325 = vmatpush3.bf16.msra.mxu0 %v1324_v50 }
 0x139   :  { %1351 = vmatprep.subr.bf16.mxu1 %v1402_v47  ;;  %1327 = vmatprep.subr.bf16.mxu0 %v1326_v55 }
 0x13c   :  { %1353 = vmatpush1.bf16.msra.mxu1 %v1352_v40  ;;  %1329 = vmatpush3.bf16.msra.mxu0 %v1328_v63 }
 0x13d   :  { %1354 = vmatprep.subr.bf16.mxu1 %v1402_v47 }
 0x140   :  { %1356 = vmatpush1.bf16.msra.mxu1 %v1355_v27 }
 0x141   :  { %1357 = vmatprep.subr.bf16.mxu1 %v1402_v47 }
 0x144   :  { %1359 = vmatpush1.bf16.msra.mxu1 %v1358_v45 }
 0x145   :  { %1360 = vmatprep.subr.bf16.mxu1 %v1402_v47 }
 0x148   :  { %1362 = vmatpush1.bf16.msra.mxu1 %v1361_v52 }
 0x149   :  { %1363 = vmatprep.subr.bf16.mxu1 %v1402_v47  ;;  %v467_v47 = vrot.slane %v458_v3, %v70_v60 }
 0x14c   :  { %1365 = vmatpush1.bf16.msra.mxu1 %v1364_v1 }
 0x1f2   :  { %v620_v7 = vpop.f32.mrb[2].mxu0  ;;  %v762_v8 = vpop.f32.mrb[2].mxu1 }
 0x1f3   :  { %v1366_v9 = vadd.f32 %v620_v7, %v463_v4  ;;  %v1368_v10 = vadd.f32 %v762_v8, %v471_v5  ;;  %v622_v11 = vpop.f32.mrb[3].mxu0  ;;  %v764_v12 = vpop.f32.mrb[3].mxu1 }
 0x1f4   :  { %v1367_v13 = vadd.f32 %v622_v11, %v467_v47  ;;  %v1369_v15 = vadd.f32 %v764_v12, %v475_v6 }
 0x1f5   :  { %v767_v16 = vmax.f32 %v1366_v9, 0.0  ;;  %v769_v17 = vmax.f32 %v1368_v10, 0.0 }
 0x1f6   :  { %v768_v58 = vmax.f32 %v1367_v13, 0.0  ;;  %v770_v18 = vmax.f32 %v1369_v15, 0.0 }
 0x1f7   :  { %771 = vst [vmem:[%s2477_s7] sm:$0xff] %v767_v16  ;;  %773 = vst [vmem:[%s2477_s7 + $0x10] sm:$0xff] %v769_v17 }
 0x1f8   :  { %772 = vst [vmem:[%s2477_s7 + $0x8] sm:$0xff] %v768_v58  ;;  %774 = vst.msk [vmem:[%s2477_s7 + $0x18] sm:$0xff] %vm84_vm0, %v770_v18  ;;  %905 = vmatprep.mubr.f32.mxu0 %v768_v58  ;;  %1006 = vmatprep.mubr.msk.f32.mxu1 %vm84_vm0, %v770_v18  ;;  %s1377_s7 = scalar_lea.vmem %s992_s9, 128 }
 0x1f9   :  { %906 = vmatmul.mubr.f32.vlgmr.msra.gmra.mrb[4].mxu0 %v767_v16  ;;  %976 = vmatmul.mubr.f32.vlgmr.msra.gmra.mrb[4].mxu1 %v769_v17  ;;  %p1378_p0 = scmp.ne.s32.totalorder %s992_s9, %s1377_s7  ;;  %p1383_p2 = scmp.lt.s32.totalorder %s1377_s7, %s1377_s7 }
 0x1fb   :  { %p1384_p3 = por %p1383_p2, %p1382_p1 }
 0x1fd   :  { %p1385_p4 = pnand %p1384_p3, %p1378_p0 }
 0x2cc   :  { %v1039_v57 = vpop.f32.mrb[4].mxu0  ;;  %v977_v60 = vpop.f32.mrb[4].mxu1 }
 0x2cd   :  { %v1040_v14 = vpop.f32.mrb[5].mxu0  ;;  %v979_v19 = vpop.f32.mrb[5].mxu1 }
 0x2ce   :  { %v1041_v20 = vadd.f32 %v1040_v14, %v1039_v57 }
 0x2d0   :  { %v908_v21 = vadd.f32 %v1041_v20, %v1005_v2 }
 0x2d2   :  { %v978_v22 = vadd.f32 %v977_v60, %v908_v21 }
 0x2d4   :  { %982 = vst.msk [vmem:[#allocation2] sm:$0xff] %vm981_vm1, %v978_v22 }
 0x2d5   :  { %1388 = shalt.err (!%p1385_p4)
}
 0x2d6   :  { %s1389_s6 = scalar_lea.hbm %s2478_s8, 128 }
 0x2d7   :  { %p1390_p5 = scmp.ne.s32.totalorder %s2478_s8, %s1389_s6  ;;  %p1393_p6 = scmp.lt.u32.totalorder %s1389_s6, %s2478_s8 }
 0x2d9   :  { %p1395_p7 = pnand %p1393_p6, %p1390_p5 }
 0x2db   :  { %1398 = shalt.err (!%p1395_p7)
}
 0x2dc   :  { %994 = dma.vmem_to_hbm [thread:$0]  %s992_s9, 128, %s2478_s8, [#allocation3]  }
 0x2dd   :  { %1399 = dma.done.wait [#allocation3], 128  }
 0x2de   :  { %1400 = vsyncadd [#allocation3], 4294967168 }
 0x2df   :  { %1000 = vsyncpa [#allocation3], 1 }

</bundles_post_ra>
